<compile_context>
chip_gen: v7x
topology: tpu7x:2x2x1
jax: 0.10.0
libtpu: 0.0.40
codegen_flags: <defaults>
</compile_context>

<pallas_src>
import functools
import math

import jax
import jax.numpy as jnp
from jax import lax
from jax.experimental import pallas as pl
from jax.experimental.pallas import tpu as pltpu

LANES = 128
SUBLANES = 8


def _tpu_vmem_capacity_bytes():
    """Best-effort physical VMEM query (128 MiB v5e/v6e, 64 MiB per-TC v7x)."""
    try:
        cap = getattr(pltpu.get_tpu_info(), "vmem_capacity_bytes", None)
        if cap:
            return int(cap)
    except Exception:
        pass
    return 64 << 20  # conservative fallback == v7x per-core VMEM


_VMEM_CAP = _tpu_vmem_capacity_bytes()
# Scoped-VMEM limits: raise past the 16/32 MiB defaults but stay <= half of
# physical so v7x (64 MiB) keeps headroom.  48 MiB on v5e/v6e, 32 MiB on v7x.
STREAM_VMEM_LIMIT = max(32 << 20, min(_VMEM_CAP // 2, 48 << 20))
FUSED_VMEM_LIMIT = max(16 << 20, min(_VMEM_CAP // 2, 48 << 20))
# Fused (x-resident) budget: in + out slabs + ~4 f32 temporaries per element,
# with a 25% safety margin folded in (checked against this at call time).
FUSED_BUDGET_BYTES = (FUSED_VMEM_LIMIT * 3) // 4

# Streaming tile: (8192, 128) f32 = 4 MiB/block.  Per-grid-step overhead
# (~0.35 us) drops to ~10% of DMA time even at v7x's 3.2 TB/s HBM; the quant
# kernel's double-buffered in+out footprint is 16 MiB, under STREAM_VMEM_LIMIT.
QUANT_BLOCK_ROWS = 8192
REDUCE_BLOCK_ROWS = 8192

# TODO(synk): on v7x a CORE_PARALLEL leading grid axis (or pl.core_map) could
# shard the two streaming passes across both TensorCores for ~2x; left single-
# core here since plain "parallel" is a no-op on v5e/v6e and unverified on v7x.


# ----------------------------- Pallas kernels ------------------------------ #

def _round_half_away(q, qn):
    """PyTorch `Round` STE forward: sign(q) * floor(|q| + 0.5).

    For quint (Qn == 0) the subsequent clamp to [0, Qp] makes plain
    floor(q + 0.5) equivalent (any negative q lands at <= 0 either way),
    saving VALU ops on the streaming pass.  qint keeps the exact sign/abs form.
    """
    if qn == 0:
        return jnp.floor(q + 0.5)
    return jnp.sign(q) * jnp.floor(jnp.abs(q) + 0.5)


def _abs_sum_scale_kernel(nrows_ref, old_scale_ref, x_ref, alpha_ref, acc_ref, *,
                          qp, n_valid, ema):
    """Tiled sum(|x|) -> new LSQ scale, emitted directly from the last step.

    acc is a single (8, 128) f32 accumulator; every tile is folded into it via
    cross-vreg VPU adds (reshape + sum over the leading axis), so there is no
    tile-sized accumulator load/store traffic competing for vld/vst slots.
    Only the final (possibly partial / out-of-range) tile pays for row masking;
    zero lane-padding in valid rows contributes 0 and the divisor is n_valid.
    """
    i = pl.program_id(0)
    steps = pl.num_programs(0)
    block_rows, lanes = x_ref.shape
    nrows = nrows_ref[0]  # valid slab rows

    @pl.when(i == 0)
    def _():
        acc_ref[...] = jnp.zeros_like(acc_ref)

    row0 = i * block_rows
    vals = jnp.abs(x_ref[...].astype(jnp.float32))  # per-tile upcast in VMEM

    @pl.when(row0 + block_rows <= nrows)            # fast path: fully in range
    def _():
        acc_ref[...] += vals.reshape(block_rows // SUBLANES, SUBLANES, lanes).sum(axis=0)

    @pl.when(row0 + block_rows > nrows)             # tail: mask ragged/OOB rows
    def _():
        row_ids = row0 + lax.broadcasted_iota(jnp.int32, (block_rows, 1), 0)
        masked = jnp.where(row_ids < nrows, vals, 0.0)
        acc_ref[...] += masked.reshape(block_rows // SUBLANES, SUBLANES, lanes).sum(axis=0)

    @pl.when(i == steps - 1)
    def _():
        s_new = (jnp.sum(acc_ref[...]) / float(n_valid)) * (2.0 / math.sqrt(qp))
        if ema:
            alpha = 0.9 * old_scale_ref[0] + 0.1 * s_new
        else:
            alpha = s_new
        alpha_ref[...] = jnp.zeros((1, 1), jnp.float32) + alpha


def _lsq_quant_kernel(scale_ref, x_ref, o_ref, *, qn, qp):
    """x_q = clamp(round(x * (1/alpha)), Qn, Qp) * alpha  (f32 math)."""
    alpha = scale_ref[0]               # f32 scalar from SMEM
    inv_alpha = 1.0 / alpha            # exact scalar reciprocal, once per tile
    q = x_ref[...].astype(jnp.float32) * inv_alpha
    rq = jnp.clip(_round_half_away(q, qn), float(qn), float(qp))
    o_ref[...] = (rq * alpha).astype(o_ref.dtype)


def _lsq_fused_kernel(scale_in_ref, x_ref, xq_ref, scale_out_ref, *,
                      qn, qp, n_valid, ema):
    """Fused path: abs-sum -> scale update -> fake-quant, x read once into VMEM.
    Zero lane-padding contributes 0 to the abs-sum; divisor is n_valid."""
    x = x_ref[...].astype(jnp.float32)
    s_new = (jnp.sum(jnp.abs(x)) / float(n_valid)) * (2.0 / math.sqrt(qp))
    if ema:
        alpha = 0.9 * scale_in_ref[0] + 0.1 * s_new
    else:
        alpha = s_new
    scale_out_ref[...] = jnp.zeros((1, 1), jnp.float32) + alpha
    q = x * (1.0 / alpha)
    rq = jnp.clip(_round_half_away(q, qn), float(qn), float(qp))
    xq_ref[...] = (rq * alpha).astype(xq_ref.dtype)


# ------------------------------ Pallas wrappers ---------------------------- #

def _to_slab(x):
    """Flatten to a lane-dense (rows, 128) slab.  Pads with zeros only when
    numel is not a multiple of 128 (the common 128-divisible case is a pure
    metadata reshape, no extra HBM pass)."""
    flat = x.reshape(-1)
    n = flat.shape[0]
    pad = (-n) % LANES
    if pad:
        flat = jnp.concatenate([flat, jnp.zeros((pad,), flat.dtype)])
    return flat.reshape(-1, LANES), n


def _from_slab(x2d, n, shape):
    flat = x2d.reshape(-1)
    if flat.shape[0] != n:
        flat = flat[:n]
    return flat.reshape(shape)


def _abs_sum_scale_pallas(x2d, old_scale, qp, n_valid, ema,
                          block_rows=REDUCE_BLOCK_ROWS):
    """Tiled sum(|x|) + scale finalize in one pallas_call; returns (1,) f32."""
    rows = x2d.shape[0]
    # block_rows must be a multiple of 8 and <= rows; the (possibly partial)
    # last grid block is handled by the in-kernel row mask.
    block_rows = min(block_rows, (rows // SUBLANES) * SUBLANES)
    assert block_rows >= SUBLANES and block_rows % SUBLANES == 0, (rows, block_rows)
    steps = pl.cdiv(rows, block_rows)
    nrows = jnp.asarray([rows], jnp.int32)
    kernel = functools.partial(_abs_sum_scale_kernel, qp=qp,
                               n_valid=n_valid, ema=ema)
    alpha = pl.pallas_call(
        kernel,
        out_shape=jax.ShapeDtypeStruct((1, 1), jnp.float32),
        grid=(steps,),
        in_specs=[
            pl.BlockSpec(memory_space=pltpu.MemorySpace.SMEM),        # nrows
            pl.BlockSpec(memory_space=pltpu.MemorySpace.SMEM),        # old scale
            pl.BlockSpec((block_rows, LANES), lambda i: (i, 0)),
        ],
        out_specs=pl.BlockSpec((1, 1), lambda i: (0, 0)),
        scratch_shapes=[pltpu.VMEM((SUBLANES, LANES), jnp.float32)],
        compiler_params=pltpu.CompilerParams(
            dimension_semantics=("arbitrary",),
            vmem_limit_bytes=STREAM_VMEM_LIMIT),
    )(nrows, old_scale, x2d)
    return alpha.reshape(1)


def _lsq_quantize_pallas(x2d, scale, qn, qp, max_block_rows=QUANT_BLOCK_ROWS):
    rows = x2d.shape[0]
    if rows <= max_block_rows:
        block_rows = rows                      # single full-extent block
    else:
        assert max_block_rows % SUBLANES == 0
        block_rows = max_block_rows            # partial last block OK (dropped rows)
    kernel = functools.partial(_lsq_quant_kernel, qn=qn, qp=qp)
    return pl.pallas_call(
        kernel,
        out_shape=jax.ShapeDtypeStruct(x2d.shape, x2d.dtype),
        grid=(pl.cdiv(rows, block_rows),),
        in_specs=[
            pl.BlockSpec(memory_space=pltpu.MemorySpace.SMEM),        # scale
            pl.BlockSpec((block_rows, LANES), lambda i: (i, 0)),
        ],
        out_specs=pl.BlockSpec((block_rows, LANES), lambda i: (i, 0)),
        compiler_params=pltpu.CompilerParams(
            dimension_semantics=("parallel",),
            vmem_limit_bytes=STREAM_VMEM_LIMIT),
    )(scale, x2d)


def _lsq_fused_pallas(x2d, scale, qn, qp, n_valid, ema):
    kernel = functools.partial(_lsq_fused_kernel, qn=qn, qp=qp,
                               n_valid=n_valid, ema=ema)
    xq, scale_out = pl.pallas_call(
        kernel,
        out_shape=(jax.ShapeDtypeStruct(x2d.shape, x2d.dtype),
                   jax.ShapeDtypeStruct((1, 1), jnp.float32)),
        in_specs=[
            pl.BlockSpec(memory_space=pltpu.MemorySpace.SMEM),        # scale
            pl.BlockSpec(memory_space=pltpu.MemorySpace.VMEM),        # x slab
        ],
        out_specs=(
            pl.BlockSpec(memory_space=pltpu.MemorySpace.VMEM),
            pl.BlockSpec(memory_space=pltpu.MemorySpace.VMEM),
        ),
        compiler_params=pltpu.CompilerParams(
            vmem_limit_bytes=FUSED_VMEM_LIMIT),
    )(scale, x2d)
    return xq, scale_out.reshape(1)


# ------------------------------- Module port -------------------------------- #

class LSQActQuantizer:
    """JAX/Pallas port of the PyTorch LSQActQuantizer forward pass.

    Note: like the nn.Module it mutates self.scale / self.observer_init as
    buffers, so it is intended for eager use (not inside jax.jit/vmap).
    """

    def __init__(self, bits, qtype='quint', quant=False, observer=False, learning=False):
        assert bits != 1, "LSQ don't support binary quantization"
        assert qtype in ('qint', 'quint'), 'qtype just support qint or quint'
        self.bits = bits
        self.qtype = qtype
        self.quant = quant
        self.observer = observer
        self.learning = learning
        if self.qtype == 'quint':
            self.Qn = 0
            self.Qp = 2 ** self.bits - 1
        else:
            self.Qn = -2 ** (self.bits - 1)
            self.Qp = 2 ** (self.bits - 1) - 1
        self.scale = jnp.ones((1,), jnp.float32)
        self.grad_factor = 1.0
        self.observer_init = 1
        # perf knobs (overridable, e.g. for tests / per-generation tuning)
        self._fused_budget_bytes = FUSED_BUDGET_BYTES
        self._reduce_block_rows = REDUCE_BLOCK_ROWS
        self._quant_block_rows = QUANT_BLOCK_ROWS

    def __call__(self, x):
        if not self.quant:
            return x
        numel = x.size
        self.grad_factor = 1.0 / math.sqrt(numel * self.Qp)
        if not (self.observer or self.learning):
            return x

        x2d, n_valid = _to_slab(x)
        rows = x2d.shape[0]
        scale_f32 = self.scale.astype(jnp.float32)

        if self.observer:
            ema = (self.observer_init != 1)
            # Fused path if input + output + f32 temporaries fit the VMEM budget
            # (or the tensor is too small for even a single 8-row reduce block).
            per_elem_bytes = 2 * x.dtype.itemsize + 16
            use_fused = (numel * per_elem_bytes <= self._fused_budget_bytes
                         or rows < SUBLANES)
            if use_fused:
                xq2d, new_scale = _lsq_fused_pallas(
                    x2d, scale_f32, self.Qn, self.Qp, n_valid=n_valid, ema=ema)
                self.scale = new_scale
            else:
                # Two streaming passes; the scale finalize (incl. EMA) is done
                # inside the reduction kernel, so no eager scalar math between.
                new_scale = _abs_sum_scale_pallas(
                    x2d, scale_f32, self.Qp, n_valid, ema,
                    block_rows=self._reduce_block_rows)
                self.scale = new_scale
                xq2d = _lsq_quantize_pallas(x2d, self.scale, self.Qn, self.Qp,
                                            self._quant_block_rows)
            self.observer_init = 0
        else:  # learning-only: quantize with the current scale
            xq2d = _lsq_quantize_pallas(x2d, scale_f32, self.Qn, self.Qp,
                                        self._quant_block_rows)

        return _from_slab(xq2d, n_valid, x.shape)


# ------------------------------ reference (jnp) ----------------------------- #

def _reference_scale(x, qp):
    return jnp.mean(jnp.abs(x)) * 2.0 / math.sqrt(qp)


def _reference_quant(x, alpha, qn, qp):
    q = x.astype(jnp.float32) * (1.0 / alpha)
    rq = jnp.clip(jnp.sign(q) * jnp.floor(jnp.abs(q) + 0.5), qn, qp)
    return (rq * alpha).astype(x.dtype)


def _check_quant_close(out, x, alpha, qn, qp, name):
    """Bin-robust comparison: elements sitting exactly on a .5 boundary may
    legally differ by one bin from the reference due to ulp-level reciprocal
    differences; everything else must match to fp tolerance."""
    ref = _reference_quant(x, alpha, qn, qp)
    diff = jnp.abs(out.astype(jnp.float32) - ref.astype(jnp.float32))
    assert float(jnp.max(diff)) <= 1.01 * float(alpha) + 1e-6, name
    assert float(jnp.mean(diff > 1e-5)) < 5e-3, name


if __name__ == "__main__":
    key = jax.random.PRNGKey(0)
    x = jax.random.normal(key, (2, 4, 16, 16), dtype=jnp.float32)  # NCHW, like PyTorch

    # 1) observer path, first call (fused kernel; scale init)
    quantizer = LSQActQuantizer(bits=8, qtype='quint', quant=True,
                                observer=True, learning=False)
    out = jax.block_until_ready(quantizer(x))
    assert out.shape == x.shape and out.dtype == x.dtype
    ref_scale = _reference_scale(x, quantizer.Qp)
    assert jnp.allclose(quantizer.scale[0], ref_scale, atol=1e-6, rtol=1e-5)
    _check_quant_close(out, x, quantizer.scale[0], quantizer.Qn, quantizer.Qp, "fused-init")

    # 2) observer path, second call (EMA branch)
    x2 = 1.5 * jax.random.normal(jax.random.PRNGKey(1), x.shape, dtype=jnp.float32)
    prev_scale = quantizer.scale[0]
    out2 = jax.block_until_ready(quantizer(x2))
    exp_scale = 0.9 * prev_scale + 0.1 * _reference_scale(x2, quantizer.Qp)
    assert jnp.allclose(quantizer.scale[0], exp_scale, atol=1e-6, rtol=1e-5)
    _check_quant_close(out2, x2, quantizer.scale[0], quantizer.Qn, quantizer.Qp, "fused-ema")

    # 3) tiled reduction + quant path, forced at small scale (evenly divisible)
    q3 = LSQActQuantizer(bits=4, qtype='qint', quant=True, observer=True, learning=False)
    q3._fused_budget_bytes = 0
    q3._reduce_block_rows = 8
    q3._quant_block_rows = 8
    out3 = jax.block_until_ready(q3(x))            # 2048 elems -> 16 rows, 2 blocks
    ref3_scale = _reference_scale(x, q3.Qp)
    assert jnp.allclose(q3.scale[0], ref3_scale, atol=1e-6, rtol=1e-5)
    _check_quant_close(out3, x, q3.scale[0], q3.Qn, q3.Qp, "tiled")

    # 3b) tiled path with a ragged last block (rows=20, block=8 -> partial block;
    #     exercises the tail row-mask and dropped out-of-bounds output rows)
    x3b = jax.random.normal(jax.random.PRNGKey(2), (4, 5, 128), dtype=jnp.float32)
    q3b = LSQActQuantizer(bits=8, qtype='quint', quant=True, observer=True, learning=False)
    q3b._fused_budget_bytes = 0
    q3b._reduce_block_rows = 8
    q3b._quant_block_rows = 8
    out3b = jax.block_until_ready(q3b(x3b))
    ref3b_scale = _reference_scale(x3b, q3b.Qp)
    assert jnp.allclose(q3b.scale[0], ref3b_scale, atol=1e-6, rtol=1e-5)
    _check_quant_close(out3b, x3b, q3b.scale[0], q3b.Qn, q3b.Qp, "tiled-ragged")

    # 4) learning-only path (quantize with existing scale = 1.0)
    q4 = LSQActQuantizer(bits=8, qtype='qint', quant=True, observer=False, learning=True)
    out4 = jax.block_until_ready(q4(x))
    ref4 = _reference_quant(x, jnp.float32(1.0), q4.Qn, q4.Qp)
    assert jnp.allclose(out4, ref4, atol=1e-5, rtol=1e-5)

    # 5) fused path with lane padding (numel % 128 != 0)
    x5 = jax.random.normal(jax.random.PRNGKey(3), (2, 3, 5, 7), dtype=jnp.float32)
    q5 = LSQActQuantizer(bits=8, qtype='quint', quant=True, observer=True, learning=False)
    out5 = jax.block_until_ready(q5(x5))
    assert out5.shape == x5.shape
    ref5_scale = _reference_scale(x5, q5.Qp)
    assert jnp.allclose(q5.scale[0], ref5_scale, atol=1e-6, rtol=1e-5)
    _check_quant_close(out5, x5, q5.scale[0], q5.Qn, q5.Qp, "fused-padded")

    print("KERNEL_OK")
</pallas_src>

<mosaic_0001>
module attributes {stable_mosaic.version = 11 : i64} {
  func.func @_lsq_fused_kernel(%arg0: memref<1xf32, #tpu.memory_space<smem>>, %arg1: memref<16x128xf32, #tpu.memory_space<vmem>>, %arg2: memref<16x128xf32, #tpu.memory_space<vmem>>, %arg3: memref<1x1xf32, #tpu.memory_space<vmem>>) attributes {dimension_semantics = [], scalar_prefetch = 0 : i64, scratch_operands = 0 : i64, tpu.core_type = #tpu.core_type<tc>} {
    %c0 = arith.constant 0 : index
    %c0_0 = arith.constant 0 : index
    %0 = vector.load %arg1[%c0, %c0_0] : memref<16x128xf32, #tpu.memory_space<vmem>>, vector<16x128xf32>
    %1 = math.absf %0 : vector<16x128xf32>
    %2 = vector.shape_cast %1 : vector<16x128xf32> to vector<1x16x128xf32>
    %cst = arith.constant dense<0.000000e+00> : vector<1xf32>
    %3 = vector.multi_reduction <add>, %2, %cst [1, 2] : vector<1x16x128xf32> to vector<1xf32>
    %4 = vector.shape_cast %3 : vector<1xf32> to vector<1x1x1xf32>
    %5 = vector.extract %4[0, 0, 0] : f32 from vector<1x1x1xf32>
    %cst_1 = arith.constant 2.048000e+03 : f32
    %6 = arith.divf %5, %cst_1 : f32
    %cst_2 = arith.constant 0.125244856 : f32
    %7 = arith.mulf %6, %cst_2 : f32
    %cst_3 = arith.constant 0.000000e+00 : f32
    %8 = vector.broadcast %cst_3 : f32 to vector<1x1xf32>
    %9 = vector.broadcast %7 : f32 to vector<1x1xf32>
    %10 = arith.addf %8, %9 : vector<1x1xf32>
    %c0_4 = arith.constant 0 : index
    %c0_5 = arith.constant 0 : index
    %11 = vector.load %arg3[%c0_4, %c0_5] : memref<1x1xf32, #tpu.memory_space<vmem>>, vector<1x1xf32>
    tpu.vector_store %arg3[%c0_4, %c0_5], %10 {strides = array<i32>} : memref<1x1xf32, #tpu.memory_space<vmem>>, vector<1x1xf32>,
    %cst_6 = arith.constant 1.000000e+00 : f32
    %12 = arith.divf %cst_6, %7 : f32
    %13 = vector.broadcast %12 : f32 to vector<16x128xf32>
    %14 = arith.mulf %0, %13 : vector<16x128xf32>
    %cst_7 = arith.constant 5.000000e-01 : f32
    %15 = vector.broadcast %cst_7 : f32 to vector<16x128xf32>
    %16 = arith.addf %14, %15 : vector<16x128xf32>
    %17 = math.floor %16 : vector<16x128xf32>
    %cst_8 = arith.constant 0.000000e+00 : f32
    %cst_9 = arith.constant 2.550000e+02 : f32
    %18 = vector.broadcast %cst_8 : f32 to vector<16x128xf32>
    %19 = arith.maximumf %18, %17 : vector<16x128xf32>
    %20 = vector.broadcast %cst_9 : f32 to vector<16x128xf32>
    %21 = arith.minimumf %20, %19 : vector<16x128xf32>
    %22 = vector.broadcast %7 : f32 to vector<16x128xf32>
    %23 = arith.mulf %21, %22 : vector<16x128xf32>
    %c0_10 = arith.constant 0 : index
    %c0_11 = arith.constant 0 : index
    %24 = vector.load %arg2[%c0_10, %c0_11] : memref<16x128xf32, #tpu.memory_space<vmem>>, vector<16x128xf32>
    tpu.vector_store %arg2[%c0_10, %c0_11], %23 {strides = array<i32>} : memref<16x128xf32, #tpu.memory_space<vmem>>, vector<16x128xf32>,
    return
  }
}

</mosaic_0001>

<bundles_post_ra>
// kernel: tpu_custom_call.1
= control target key start
LH: loop header
LB: loop body
LE: loop exit
PB: predicated region body
PF: predicated region fallthrough
CT: control target
= control target key end

     0   :  { %10 = vsyncpa [#allocation4], 0  ;;  %s251_s0 = inlined_call_operand.<no memory space> [shape: f32[1], index: 0, kind: input, shape index: {}]   ;;  %s252_s1 = inlined_call_operand.hbm [shape: f32[16,128], index: 1, kind: input, shape index: {}]   ;;  %s253_s2 = inlined_call_operand.hbm [shape: f32[16,128], index: 2, kind: output, shape index: {0}]   ;;  %s254_s3 = inlined_call_operand.hbm [shape: f32[1,1], index: 3, kind: output, shape index: {1}]  }
   0x1   :  { %11 = vsyncpa [#allocation5], 0 }
   0x2   :  { %12 = vsyncpa [#allocation8], 0  ;;  %s184_s12 = smov [#allocation3]   ;;  %s112_s16 = scalar_lea.hbm %s252_s1, 256 }
   0x3   :  { %s20_s13 = sshll.u32 %s184_s12, 4  ;;  %p113_p0 = scmp.ne.s32.totalorder %s252_s1, %s112_s16  ;;  %s21_s13 = int_to_ptr.vmem [resolvable:$true] %s20_s13 }
   0x4   :  { %p116_p1 = scmp.lt.u32.totalorder %s112_s16, %s252_s1 }
   0x6   :  { %p118_p2 = pnand %p116_p1, %p113_p0 }
   0x8   :  { %121 = shalt.err (!%p118_p2)
}
   0x9   :  { %s122_s20 = scalar_lea.vmem %s21_s13, 256  ;;  %p127_p4 = scmp.lt.s32.totalorder %s21_s13, %s21_s13 }
   0xa   :  { %p123_p3 = scmp.ne.s32.totalorder %s21_s13, %s122_s20  ;;  %p128_p5 = scmp.lt.s32.totalorder %s122_s20, %s122_s20 }
   0xc   :  { %p129_p6 = por %p128_p5, %p127_p4 }
   0xe   :  { %p130_p7 = pnand %p129_p6, %p123_p3 }
  0x10   :  { %133 = shalt.err (!%p130_p7)
}
  0x11   :  { %s185_s21 = smov 128   ;;  %s186_s22 = smov 8  }
  0x12   :  { %26 = dma.hbm_to_vmem [thread:$0]  %s252_s1, 256, %s21_s13, [#allocation4], %s185_s21, %s185_s21, %s186_s22  }
  0x13   :  { %178 = dma.done.wait [#allocation4], 256  }
  0x14   :  { %179 = vsyncadd [#allocation4], 4294967040  ;;  %v30_v0 = vld [vmem:[#allocation3] sm:$0xff]  ;;  %v31_v1 = vld [vmem:[#allocation3 + $0x8] sm:$0xff]  ;;  %s187_s27 = smov [#allocation7]   ;;  %vm50_vm0 = vcmask 0  }
  0x15   :  { %v32_v2 = vand.u32 2147483647, %v30_v0  ;;  %v33_v3 = vand.u32 2147483647, %v31_v1  ;;  %s88_s1 = sshll.u32 %s187_s27, 4  ;;  %s89_s1 = int_to_ptr.vmem [resolvable:$true] %s88_s1 }
  0x16   :  { %s134_s29 = scalar_lea.vmem %s89_s1, 16  ;;  %s138_s30 = scalar_lea.vmem %s89_s1, 32 }
  0x17   :  { %v34_v4 = vadd.f32 %v33_v3, %v32_v2  ;;  %p135_p8 = scmp.ne.s32.totalorder %s89_s1, %s134_s29  ;;  %p139_p9 = scmp.lt.s32.totalorder %s89_s1, %s89_s1 }
  0x18   :  { %p140_p10 = scmp.lt.s32.totalorder %s138_s30, %s134_s29 }
  0x19   :  { %35 = vadd.xlane.f32.xlu0 %v34_v4 }
  0x1a   :  { %p141_p11 = por %p140_p10, %p139_p9 }
  0x1c   :  { %p142_p12 = pnand %p141_p11, %p135_p8 }
  0xa6   :  { %v36_v5 = vpop.xlane.xlu0 %35 }
  0xa7   :  { %v37_v6 = vrot.slane %v36_v5, 4 }
  0xa9   :  { %v38_v7 = vadd.f32 %v37_v6, %v36_v5 }
  0xab   :  { %v39_v8 = vrot.slane %v38_v7, 2 }
  0xad   :  { %v40_v9 = vadd.f32 %v39_v8, %v38_v7 }
  0xaf   :  { %v41_v10 = vrot.slane %v40_v9, 1 }
  0xb1   :  { %v42_v11 = vadd.f32 %v41_v10, %v40_v9 }
  0xb3   :  { %101 = vpush %v42_v11 }
  0xe4   :  { %s102_s25 = spop %101 }
  0xe5   :  { %s46_s26 = smul.f32 0.00048828125, %s102_s25 }
  0xe7   :  { %s47_s28 = smul.f32 0.12524486, %s46_s26 }
  0xe9   :  { %v48_v12 = vstv %s47_s28 }
  0xea   :  { %110 = vrcp.f32 %v48_v12  ;;  %51 = vst.msk [vmem:[#allocation7] sm:$0x1] %vm50_vm0, %v48_v12 }
  0xeb   :  { %145 = shalt.err (!%p142_p12)
}
  0xec   :  { %s146_s6 = scalar_lea.hbm %s254_s3, 16 }
  0xed   :  { %p147_p13 = scmp.ne.s32.totalorder %s254_s3, %s146_s6  ;;  %p150_p0 = scmp.lt.u32.totalorder %s146_s6, %s254_s3 }
  0xef   :  { %p152_p1 = pnand %p150_p0, %p147_p13 }
  0xf1   :  { %155 = shalt.err (!%p152_p1)
}
  0xf2   :  { %91 = dma.vmem_to_hbm [thread:$0]  %s89_s1, 16, %s254_s3, [#allocation8]  }
  0xf3   :  { %s188_s14 = smov [#allocation6]  }
  0xf4   :  { %v111_v13 = vpop.eup %110  ;;  %s75_s15 = sshll.u32 %s188_s14, 4  ;;  %s76_s15 = int_to_ptr.vmem [resolvable:$true] %s75_s15 }
  0xf5   :  { %103 = vpush %v111_v13  ;;  %s156_s3 = scalar_lea.vmem %s76_s15, 256  ;;  %p161_p3 = scmp.lt.s32.totalorder %s76_s15, %s76_s15 }
  0xf6   :  { %p157_p2 = scmp.ne.s32.totalorder %s76_s15, %s156_s3  ;;  %p162_p4 = scmp.lt.s32.totalorder %s156_s3, %s156_s3 }
  0xf8   :  { %p163_p5 = por %p162_p4, %p161_p3 }
  0xfa   :  { %p164_p6 = pnand %p163_p5, %p157_p2 }
 0x126   :  { %s104_s13 = spop %103 }
 0x127   :  { %v55_v14 = vstv %s104_s13 }
 0x128   :  { %v56_v15 = vmul.f32 %v55_v14, %v30_v0  ;;  %v57_v16 = vmul.f32 %v55_v14, %v31_v1 }
 0x12a   :  { %v58_v17 = vadd.f32 0.5, %v56_v15  ;;  %v59_v18 = vadd.f32 0.5, %v57_v16 }
 0x12c   :  { %v60_v19 = vfloor.f32 %v58_v17  ;;  %v61_v20 = vfloor.f32 %v59_v18 }
 0x12e   :  { %v62_v21 = vmax.f32 %v60_v19, 0.0  ;;  %v63_v22 = vmax.f32 %v61_v20, 0.0 }
 0x130   :  { %v64_v23 = vmin.f32 %v62_v21, 255.0  ;;  %v65_v24 = vmin.f32 %v63_v22, 255.0 }
 0x132   :  { %v66_v25 = vmul.f32 %v64_v23, %v48_v12  ;;  %v67_v26 = vmul.f32 %v65_v24, %v48_v12 }
 0x134   :  { %68 = vst [vmem:[#allocation6] sm:$0xff] %v66_v25  ;;  %69 = vst [vmem:[#allocation6 + $0x8] sm:$0xff] %v67_v26 }
 0x135   :  { %167 = shalt.err (!%p164_p6)
}
 0x136   :  { %s168_s17 = scalar_lea.hbm %s253_s2, 256 }
 0x137   :  { %p169_p7 = scmp.ne.s32.totalorder %s253_s2, %s168_s17  ;;  %p172_p8 = scmp.lt.u32.totalorder %s168_s17, %s253_s2 }
 0x139   :  { %p174_p9 = pnand %p172_p8, %p169_p7 }
 0x13b   :  { %177 = shalt.err (!%p174_p9)
}
 0x13c   :  { %81 = dma.vmem_to_hbm [thread:$0]  %s76_s15, 256, %s253_s2, [#allocation5], %s185_s21, %s185_s21, %s186_s22  }
 0x13d   :  { %180 = dma.done.wait [#allocation5], 256  }
 0x13e   :  { %181 = vsyncadd [#allocation5], 4294967040 }
 0x13f   :  { %182 = dma.done.wait [#allocation8], 16  }
 0x140   :  { %183 = vsyncadd [#allocation8], 4294967280 }
 0x141   :  { %98 = vsyncpa [#allocation4], 1 }
 0x142   :  { %99 = vsyncpa [#allocation5], 1 }
 0x143   :  { %100 = vsyncpa [#allocation8], 1 }

</bundles_post_ra>
